<compile_context>
chip_gen: v6e
topology: v6e:2x2x1
jax: 0.10.0
libtpu: 0.0.40
codegen_flags: <defaults>
</compile_context>

<pallas_src>
import jax
import jax.numpy as jnp
from jax.experimental import pallas as pl
from jax.experimental.pallas import tpu as pltpu

CLIP_MIN = -0.1
CLIP_MAX = 0.2

_LANES = 1024                          # lane-dense last dim (multiple of 128)
_TARGET_BLOCK_BYTES = 2 * 1024 * 1024  # ~2 MiB per block (4 dbl-buffers ~8 MiB)


def _clip_kernel(x_ref, o_ref):
    x = x_ref[...]
    lo = jnp.asarray(CLIP_MIN, x.dtype)   # keep compute in input dtype
    hi = jnp.asarray(CLIP_MAX, x.dtype)
    o_ref[...] = jnp.minimum(jnp.maximum(x, lo), hi)


@jax.jit
def clip(x: jax.Array) -> jax.Array:
    """Elementwise clamp(x, -0.1, 0.2) via a tiled, lane-dense Pallas kernel."""
    orig_shape = x.shape
    dtype = x.dtype
    itemsize = jnp.dtype(dtype).itemsize
    # Sublane alignment: 8 rows for 32-bit, 16 for bf16/fp16, 32 for int8/fp8.
    row_align = 8 * max(1, 4 // itemsize)

    flat = x.reshape(-1)
    total = flat.shape[0]

    # Rows of the lane-dense slab, rounded to sublane packing alignment.
    rows = pl.cdiv(total, _LANES)
    rows = ((rows + row_align - 1) // row_align) * row_align

    # Block row count targeting ~2 MiB per block, aligned to sublane packing.
    target_rows = max(
        row_align,
        (_TARGET_BLOCK_BYTES // (_LANES * itemsize)) // row_align * row_align,
    )
    tr = min(target_rows, rows)
    # Round rows up so the grid divides evenly (no ragged edge blocks).
    rows = ((rows + tr - 1) // tr) * tr

    padded_total = rows * _LANES
    if padded_total != total:
        flat = jnp.pad(flat, (0, padded_total - total))
    x2d = flat.reshape(rows, _LANES)

    grid = (rows // tr,)
    out2d = pl.pallas_call(
        _clip_kernel,
        out_shape=jax.ShapeDtypeStruct((rows, _LANES), dtype),
        grid=grid,
        in_specs=[pl.BlockSpec((tr, _LANES), lambda i: (i, 0))],
        out_specs=pl.BlockSpec((tr, _LANES), lambda i: (i, 0)),
        compiler_params=pltpu.CompilerParams(
            dimension_semantics=("parallel",),   # megacore sharding on v7x
            vmem_limit_bytes=32 << 20,           # safe on v5e/v6e/v7x
        ),
    )(x2d)

    out_flat = out2d.reshape(-1)
    if padded_total != total:
        out_flat = out_flat[:total]
    return out_flat.reshape(orig_shape)


if __name__ == "__main__":
    key = jax.random.PRNGKey(0)
    # Small NCHW input consistent with the module's expected conv-style input.
    x = jax.random.normal(key, (2, 4, 16, 16), dtype=jnp.float32)

    y = clip(x)
    jax.block_until_ready(y)

    # Correctness check against plain JAX reference.
    y_ref = jnp.clip(x, CLIP_MIN, CLIP_MAX)
    assert y.shape == x.shape and y.dtype == x.dtype
    assert bool(jnp.allclose(y, y_ref)), "mismatch vs reference clamp"

    print("KERNEL_OK")
</pallas_src>

<mosaic_0001>
module attributes {stable_mosaic.version = 11 : i64} {
  func.func @_clip_kernel(%arg0: i32, %arg1: memref<8x1024xf32, #tpu.memory_space<vmem>>, %arg2: memref<8x1024xf32, #tpu.memory_space<vmem>>) attributes {dimension_semantics = [#tpu.dimension_semantics<parallel>], iteration_bounds = array<i64: 1>, scalar_prefetch = 0 : i64, scratch_operands = 0 : i64, tpu.core_type = #tpu.core_type<tc>, window_params = [{transform_indices = @transform_0, window_bounds = array<i64: 8, 1024>}, {transform_indices = @transform_1, window_bounds = array<i64: 8, 1024>}]} {
    %c0 = arith.constant 0 : index
    %c0_0 = arith.constant 0 : index
    %0 = vector.load %arg1[%c0, %c0_0] : memref<8x1024xf32, #tpu.memory_space<vmem>>, vector<8x1024xf32>
    %cst = arith.constant -1.000000e-01 : f32
    %1 = vector.broadcast %cst : f32 to vector<8x1024xf32>
    %2 = arith.maximumf %0, %1 : vector<8x1024xf32>
    %cst_1 = arith.constant 2.000000e-01 : f32
    %3 = vector.broadcast %cst_1 : f32 to vector<8x1024xf32>
    %4 = arith.minimumf %2, %3 : vector<8x1024xf32>
    %c0_2 = arith.constant 0 : index
    %c0_3 = arith.constant 0 : index
    %5 = vector.load %arg2[%c0_2, %c0_3] : memref<8x1024xf32, #tpu.memory_space<vmem>>, vector<8x1024xf32>
    tpu.vector_store %arg2[%c0_2, %c0_3], %4 {strides = array<i32>} : memref<8x1024xf32, #tpu.memory_space<vmem>>, vector<8x1024xf32>,
    return
  }
  func.func @transform_0(%arg0: i32) -> (i32, i32) {
    %c0_i32 = arith.constant 0 : i32
    %c0_i32_0 = arith.constant 0 : i32
    return %arg0, %c0_i32 : i32, i32
  }
  func.func @transform_1(%arg0: i32) -> (i32, i32) {
    %c0_i32 = arith.constant 0 : i32
    %c0_i32_0 = arith.constant 0 : i32
    return %arg0, %c0_i32 : i32, i32
  }
}

</mosaic_0001>

<bundles_post_ra>
// kernel: clip.1
= control target key start
LH: loop header
LB: loop body
LE: loop exit
PB: predicated region body
PF: predicated region fallthrough
CT: control target
= control target key end

     0   :  { %s102_s0 = inlined_call_operand.vmem [shape: f32[8,1024], index: 0, kind: input, shape index: {}]   ;;  %s103_s1 = inlined_call_operand.vmem [shape: f32[8,1024], index: 1, kind: output, shape index: {}]  }
   0x1   :  { %v8_v0 = vld [vmem:[%s102_s0] sm:$0xff]  ;;  %v9_v1 = vld [vmem:[%s102_s0 + $0x8] sm:$0xff]  ;;  %v10_v2 = vld [vmem:[%s102_s0 + $0x10] sm:$0xff] }
   0x2   :  { %v16_v3 = vmax.f32 %v8_v0, -0.1  ;;  %v17_v4 = vmax.f32 %v9_v1, -0.1  ;;  %v18_v5 = vmax.f32 %v10_v2, -0.1 }
   0x3   :  { %v11_v6 = vld [vmem:[%s102_s0 + $0x18] sm:$0xff]  ;;  %v12_v7 = vld [vmem:[%s102_s0 + $0x20] sm:$0xff]  ;;  %v13_v8 = vld [vmem:[%s102_s0 + $0x28] sm:$0xff] }
   0x4   :  { %v24_v9 = vmin.f32 %v16_v3, 0.2  ;;  %v25_v10 = vmin.f32 %v17_v4, 0.2  ;;  %v26_v11 = vmin.f32 %v18_v5, 0.2 }
   0x5   :  { %v19_v12 = vmax.f32 %v11_v6, -0.1  ;;  %v20_v13 = vmax.f32 %v12_v7, -0.1  ;;  %v21_v14 = vmax.f32 %v13_v8, -0.1 }
   0x6   :  { %32 = vst [vmem:[%s103_s1] sm:$0xff] %v24_v9  ;;  %33 = vst [vmem:[%s103_s1 + $0x8] sm:$0xff] %v25_v10  ;;  %v14_v15 = vld [vmem:[%s102_s0 + $0x30] sm:$0xff]  ;;  %v15_v16 = vld [vmem:[%s102_s0 + $0x38] sm:$0xff] }
   0x7   :  { %34 = vst [vmem:[%s103_s1 + $0x10] sm:$0xff] %v26_v11  ;;  %v27_v17 = vmin.f32 %v19_v12, 0.2  ;;  %v28_v18 = vmin.f32 %v20_v13, 0.2 }
   0x8   :  { %v29_v19 = vmin.f32 %v21_v14, 0.2  ;;  %v22_v20 = vmax.f32 %v14_v15, -0.1  ;;  %v23_v21 = vmax.f32 %v15_v16, -0.1 }
   0x9   :  { %35 = vst [vmem:[%s103_s1 + $0x18] sm:$0xff] %v27_v17  ;;  %36 = vst [vmem:[%s103_s1 + $0x20] sm:$0xff] %v28_v18 }
   0xa   :  { %37 = vst [vmem:[%s103_s1 + $0x28] sm:$0xff] %v29_v19  ;;  %v30_v22 = vmin.f32 %v22_v20, 0.2  ;;  %v31_v23 = vmin.f32 %v23_v21, 0.2 }
   0xc   :  { %38 = vst [vmem:[%s103_s1 + $0x30] sm:$0xff] %v30_v22  ;;  %39 = vst [vmem:[%s103_s1 + $0x38] sm:$0xff] %v31_v23 }

</bundles_post_ra>
